<compile_context>
chip_gen: v6e
topology: v6e:2x2x1
jax: 0.10.0
libtpu: 0.0.40
codegen_flags: <defaults>
</compile_context>

<pallas_src>
import functools

import numpy as np
import jax
import jax.numpy as jnp
from jax.experimental import pallas as pl
from jax.experimental.pallas import tpu as pltpu


# ---------------------------------------------------------------------------
# patch / un-patch helpers (used only by the plain-JAX reference checker)
# ---------------------------------------------------------------------------
def patch_tensor(x, mesh):
    B, C, H, W = x.shape
    x = x.reshape(B, C, mesh, H // mesh, mesh, W // mesh)
    x = jnp.transpose(x, (0, 2, 4, 1, 3, 5))
    return x.reshape(-1, C, H // mesh, W // mesh)


def un_patch_tensor(x, mesh):
    N, C, h, w = x.shape
    x = x.reshape(-1, mesh, mesh, C, h, w)
    x = jnp.transpose(x, (0, 3, 1, 4, 2, 5))
    return x.reshape(x.shape[0], C, mesh * h, mesh * w)


# ---------------------------------------------------------------------------
# fused forward kernel
# ---------------------------------------------------------------------------
def _fused_tsunet_kernel(x_ref, mw_ref, w1_ref, b1_ref, w2s_ref, b2s_ref, o_ref,
                         *, tile, nc, row_lo, row_hi):
    """One (pixel-tile, batch) block of the entire TSUnet forward.

    x_ref  : (Cin, T)     f32   input pixels (channels on sublanes, pixels on lanes)
    mw_ref : (1, T)       bf16  column band mask (reused across batch steps)
    w1_ref : (hid, Cin)   bf16  } per-pixel S_part stand-in, layer 1
    b1_ref : (hid, 1)     bf16  }
    w2s_ref: (3*nc, hid)  bf16  layer 2 with the `fine` 1x1 conv folded in
    b2s_ref: (3*nc, 1)    f32   folded biases (fine bias folded into rows :nc)
    o_ref  : (nc, T)      f32   output pixels (lane-dense stores)
    """
    xb = x_ref[...].astype(jnp.bfloat16)                          # (Cin, T)

    # --- S_part layer 1: MXU with f32 accumulate, bf16 bias+ReLU epilogue ---
    h = jnp.dot(w1_ref[...], xb, preferred_element_type=jnp.float32)
    h = jnp.maximum(h.astype(jnp.bfloat16) + b1_ref[...], 0)      # (hid, T) bf16

    # --- S_part layer 2 with the `fine` head folded into the weights --------
    #   z[:nc]      = W0 @ y   (+ fine bias)     -> unshifted branch
    #   z[nc:2nc]   = W1 @ y                     -> H-shifted branch
    #   z[2nc:3nc]  = W2 @ y                     -> W-shifted branch
    z = jnp.dot(w2s_ref[...], h, preferred_element_type=jnp.float32)
    z = z + b2s_ref[...]                                          # (3*nc, T) f32

    # --- zero-band + half-patch roll-back, expressed as per-pixel masks -----
    # Row band generated in-kernel from the flat pixel index (no HBM traffic).
    gidx = (jax.lax.broadcasted_iota(jnp.int32, (1, tile), 1)
            + pl.program_id(0) * tile)                            # (1, T)
    row_band = (gidx >= row_lo) & (gidx < row_hi)                 # (1, T) bool

    z0 = z[:nc, :]
    zh = jnp.where(row_band, z[nc:2 * nc, :], 0.0)                # H-shift branch
    zw = z[2 * nc:, :] * mw_ref[...].astype(jnp.float32)          # W-shift branch

    o_ref[...] = jnp.maximum(z0 + zh + zw, 0.0)                   # fused ReLU


def _pick_pixel_tile(hw, batch, max_tile=32768, min_steps=4):
    """Lane-dense pixel tile: a multiple of 128 (or the whole image when it is
    smaller than 128), capped at `max_tile` for VMEM, and shrunk until the
    grid has >= `min_steps` steps (keeps both v7x TensorCores busy and keeps
    the pipeline flowing).  Prefers an exact divisor of `hw`; otherwise the
    grid uses cdiv with a padded tail block (OOB writes are dropped)."""
    if hw <= 128:
        return hw                                   # single full-dim block
    cap = min(max_tile, (hw // 128) * 128)
    while cap > 128 and batch * (-(-hw // cap)) < min_steps:
        cap = max(128, ((cap // 2) // 128) * 128)
    t = cap
    while t >= 128:                                 # prefer no padded tail
        if hw % t == 0:
            return t
        t -= 128
    return cap                                      # padded tail block


# ---------------------------------------------------------------------------
# TSUnet model in JAX/Pallas
# ---------------------------------------------------------------------------
class TSUnetPallas:
    def __init__(self, mesh=2, in_ch=3, hidden=32, n_classes=2, key=None,
                 max_tile=32768):
        self.mesh = mesh
        self.in_ch = in_ch
        self.hidden = hidden
        self.n_classes = n_classes
        self.max_tile = max_tile
        key = key if key is not None else jax.random.PRNGKey(42)
        k1, k2, k3, k4, k5, k6 = jax.random.split(key, 6)
        nc = n_classes

        # S_part stand-in parameters (see TODO at top of file).
        w1 = jax.random.normal(k1, (hidden, in_ch), jnp.float32) * 0.1
        b1 = jax.random.normal(k2, (hidden,), jnp.float32) * 0.1
        w2 = jax.random.normal(k3, (nc, hidden), jnp.float32) * 0.1
        b2 = jax.random.normal(k4, (nc,), jnp.float32) * 0.1
        # fine = Conv2d(3*nc, nc, 1, 1) + ReLU
        wf = jax.random.normal(k5, (nc, 3 * nc), jnp.float32) * 0.1
        bf = jax.random.normal(k6, (nc,), jnp.float32) * 0.1

        # kernel-side parameters (pre-transposed, bf16 for the MXU)
        self.w1t = w1.astype(jnp.bfloat16)                       # (hid, Cin)
        self.b1 = b1.reshape(hidden, 1).astype(jnp.bfloat16)     # bf16 epilogue
        self.w2t = w2.astype(jnp.bfloat16)                       # used by reference
        self.b2 = b2
        self.wf = wf
        self.bf = bf

        # Fold the `fine` 1x1 conv (and its bias) into the second matmul:
        #   out = ReLU(W0@y + (W1@y)*mask_h + (W2@y)*mask_w + bf), y = w2@h + b2
        #   =>  z = [W0;W1;W2] @ w2 @ h + [W0@b2 + bf; W1@b2; W2@b2]
        #       out = ReLU(z0 + z1*mask_h + z2*mask_w)
        w2q = self.w2t.astype(jnp.float32)          # bf16-rounded w2 (matches ref)
        W0, W1, W2 = wf[:, :nc], wf[:, nc:2 * nc], wf[:, 2 * nc:]
        self.w2s = jnp.concatenate([W0 @ w2q, W1 @ w2q, W2 @ w2q], axis=0
                                   ).astype(jnp.bfloat16)        # (3*nc, hid)
        self.b2s = jnp.concatenate([W0 @ b2 + bf, W1 @ b2, W2 @ b2], axis=0
                                   ).reshape(3 * nc, 1).astype(jnp.float32)

    def _col_mask(self, H, W):
        """Column band mask encoding 'W-shift -> S_part -> zero last patch ->
        shift back' for the per-pixel stand-in.  Built with numpy so it is a
        jit-time constant; stored bf16 (2 B/px) and reused across the batch."""
        p = W // self.mesh            # reference uses size(-1) for the band width
        s = p // 2
        ww = np.arange(W)
        mask_w = ((ww >= s) & (ww < W - p + s)).astype(np.float32)
        mw = np.broadcast_to(mask_w[None, :], (H, W)).reshape(1, H * W)
        return jnp.asarray(np.ascontiguousarray(mw), dtype=jnp.bfloat16)

    def __call__(self, x):
        B, C, H, W = x.shape
        assert C == self.in_ch
        HW = H * W
        nc, hid = self.n_classes, self.hidden

        # Row band limits on the flat (row-major) pixel index; the reference's
        # quirk of using size(-1)=W for both band widths is reproduced.
        p = W // self.mesh
        s = p // 2
        row_lo = s * W
        row_hi = (H - p + s) * W

        x3 = x.reshape(B, C, HW)              # free reshape, no transpose
        mw = self._col_mask(H, W)             # (1, HW) bf16 constant

        T = _pick_pixel_tile(HW, B, self.max_tile)
        n_pix = pl.cdiv(HW, T)
        # Pixel-tile outer, batch inner: the column-mask block index depends
        # only on the outer axis, so its DMA is skipped on the inner batch
        # steps (the tile is reused from VMEM).
        grid = (n_pix, B)

        kernel = functools.partial(_fused_tsunet_kernel, tile=T, nc=nc,
                                   row_lo=row_lo, row_hi=row_hi)

        out = pl.pallas_call(
            kernel,
            out_shape=jax.ShapeDtypeStruct((B, nc, HW), jnp.float32),
            grid=grid,
            in_specs=[
                pl.BlockSpec((None, C, T), lambda j, b: (b, 0, j)),    # x
                pl.BlockSpec((1, T), lambda j, b: (0, j)),             # col mask
                pl.BlockSpec((hid, C), lambda j, b: (0, 0)),           # w1t
                pl.BlockSpec((hid, 1), lambda j, b: (0, 0)),           # b1
                pl.BlockSpec((3 * nc, hid), lambda j, b: (0, 0)),      # w2s
                pl.BlockSpec((3 * nc, 1), lambda j, b: (0, 0)),        # b2s
            ],
            out_specs=pl.BlockSpec((None, nc, T), lambda j, b: (b, 0, j)),
            compiler_params=pltpu.CompilerParams(
                dimension_semantics=("parallel", "parallel"),
                vmem_limit_bytes=48 * 1024 * 1024),
        )(x3, mw, self.w1t, self.b1, self.w2s, self.b2s)

        out = out.reshape(B, nc, H, W)        # free reshape back to NCHW
        return [out]                          # TSUnet / S_part return a list


# ---------------------------------------------------------------------------
# plain-JAX mirror of the original (unfused) forward — validation only
# ---------------------------------------------------------------------------
def _reference_forward(x, model):
    mesh = model.mesh

    def s_part(t):                             # (N, C, h, w) -> (N, nc, h, w)
        acc = jnp.einsum('kc,nchw->nkhw', model.w1t, t.astype(jnp.bfloat16),
                         preferred_element_type=jnp.float32)
        h = jnp.maximum(acc.astype(jnp.bfloat16)
                        + model.b1[:, 0][None, :, None, None], 0)
        y = jnp.einsum('ok,nkhw->nohw', model.w2t, h,
                       preferred_element_type=jnp.float32)
        return y + model.b2[None, :, None, None]

    B, C, H, W = x.shape
    p = W // mesh
    s = p // 2
    moved_x = jnp.concatenate([x[..., s:, :], x[..., :s, :]], axis=-2)
    moved_y = jnp.concatenate([x[..., s:], x[..., :s]], axis=-1)

    def branch(t):
        return un_patch_tensor(s_part(patch_tensor(t, mesh)), mesh)

    oxi = branch(x)
    omx = branch(moved_x)
    omy = branch(moved_y)

    p2 = oxi.shape[-1] // mesh
    s2 = p2 // 2
    omx = omx.at[..., -p2:, :].set(0.0)
    omx = jnp.concatenate([omx[..., -s2:, :], omx[..., :-s2, :]], axis=-2)
    omy = omy.at[..., -p2:].set(0.0)
    omy = jnp.concatenate([omy[..., -s2:], omy[..., :-s2]], axis=-1)

    cat = jnp.concatenate([oxi, omx, omy], axis=1)             # (B, 3*nc, H, W)
    o = jnp.einsum('bchw,oc->bohw', cat, model.wf,
                   precision=jax.lax.Precision.HIGHEST)
    o = o + model.bf[None, :, None, None]
    return [jnp.maximum(o, 0.0)]


# ---------------------------------------------------------------------------
# main
# ---------------------------------------------------------------------------
if __name__ == "__main__":
    B, C, H, W = 2, 3, 32, 32       # small shapes; mesh=2 -> 16x16 patches
    x = jax.random.normal(jax.random.PRNGKey(0), (B, C, H, W), jnp.float32)

    model = TSUnetPallas(mesh=2, in_ch=C, hidden=32, n_classes=2,
                         key=jax.random.PRNGKey(1))

    fwd = jax.jit(model.__call__)
    outs = fwd(x)
    outs = [jax.block_until_ready(o) for o in outs]

    assert len(outs) == 1
    assert outs[0].shape == (B, 2, H, W), outs[0].shape
    assert outs[0].dtype == jnp.float32
    assert bool(jnp.all(outs[0] >= 0.0))            # ReLU output

    # validate the fused kernel against the unfused plain-JAX reference
    ref = jax.jit(lambda t: _reference_forward(t, model))(x)
    ref = [jax.block_until_ready(r) for r in ref]
    max_err = float(jnp.max(jnp.abs(outs[0] - ref[0])))
    assert jnp.allclose(outs[0], ref[0], atol=2e-3, rtol=2e-2), max_err

    # exercise the multi-pixel-tile grid path (several outer steps, column-mask
    # tile reused across the inner batch axis without re-DMA)
    model.max_tile = 128
    outs2 = jax.jit(model.__call__)(x)
    outs2 = [jax.block_until_ready(o) for o in outs2]
    max_err2 = float(jnp.max(jnp.abs(outs2[0] - ref[0])))
    assert jnp.allclose(outs2[0], ref[0], atol=2e-3, rtol=2e-2), max_err2

    print("KERNEL_OK")
</pallas_src>

<mosaic_0001>
module attributes {stable_mosaic.version = 11 : i64} {
  func.func @_fused_tsunet_kernel(%arg0: i32, %arg1: i32, %arg2: memref<1x3x512xf32, #tpu.memory_space<vmem>>, %arg3: memref<1x512xbf16, #tpu.memory_space<vmem>>, %arg4: memref<32x3xbf16, #tpu.memory_space<vmem>>, %arg5: memref<32x1xbf16, #tpu.memory_space<vmem>>, %arg6: memref<6x32xbf16, #tpu.memory_space<vmem>>, %arg7: memref<6x1xf32, #tpu.memory_space<vmem>>, %arg8: memref<1x2x512xf32, #tpu.memory_space<vmem>>) attributes {dimension_semantics = [#tpu.dimension_semantics<parallel>, #tpu.dimension_semantics<parallel>], iteration_bounds = array<i64: 2, 2>, scalar_prefetch = 0 : i64, scratch_operands = 0 : i64, tpu.core_type = #tpu.core_type<tc>, window_params = [{transform_indices = @transform_0, window_bounds = array<i64: 1, 3, 512>}, {transform_indices = @transform_1, window_bounds = array<i64: 1, 512>}, {pipeline_mode = #tpu.pipeline_mode<synchronous>, transform_indices = @transform_2, window_bounds = array<i64: 32, 3>}, {pipeline_mode = #tpu.pipeline_mode<synchronous>, transform_indices = @transform_3, window_bounds = array<i64: 32, 1>}, {pipeline_mode = #tpu.pipeline_mode<synchronous>, transform_indices = @transform_4, window_bounds = array<i64: 6, 32>}, {pipeline_mode = #tpu.pipeline_mode<synchronous>, transform_indices = @transform_5, window_bounds = array<i64: 6, 1>}, {transform_indices = @transform_6, window_bounds = array<i64: 1, 2, 512>}]} {
    %c0 = arith.constant 0 : index
    %c0_0 = arith.constant 0 : index
    %c0_1 = arith.constant 0 : index
    %0 = vector.load %arg2[%c0, %c0_0, %c0_1] : memref<1x3x512xf32, #tpu.memory_space<vmem>>, vector<1x3x512xf32>
    %1 = vector.shape_cast %0 : vector<1x3x512xf32> to vector<3x512xf32>
    %2 = arith.truncf %1 : vector<3x512xf32> to vector<3x512xbf16>
    %c0_2 = arith.constant 0 : index
    %c0_3 = arith.constant 0 : index
    %3 = vector.load %arg4[%c0_2, %c0_3] : memref<32x3xbf16, #tpu.memory_space<vmem>>, vector<32x3xbf16>
    %cst = arith.constant dense<0.000000e+00> : vector<32x512xf32>
    %4 = tpu.matmul %3, %2, %cst {dimension_numbers = #tpu.dot_dimension_numbers<[1], [0], [0], [1], [0, 0, 1, 1], [], []>} : vector<32x3xbf16>, vector<3x512xbf16>, vector<32x512xf32> -> vector<32x512xf32>
    %5 = arith.truncf %4 : vector<32x512xf32> to vector<32x512xbf16>
    %c0_4 = arith.constant 0 : index
    %c0_5 = arith.constant 0 : index
    %6 = vector.load %arg5[%c0_4, %c0_5] : memref<32x1xbf16, #tpu.memory_space<vmem>>, vector<32x1xbf16>
    %7 = vector.broadcast %6 : vector<32x1xbf16> to vector<32x512xbf16>
    %8 = arith.addf %5, %7 : vector<32x512xbf16>
    %cst_6 = arith.constant 0.000000e+00 : bf16
    %9 = vector.broadcast %cst_6 : bf16 to vector<32x512xbf16>
    %10 = arith.maximumf %8, %9 : vector<32x512xbf16>
    %c0_7 = arith.constant 0 : index
    %c0_8 = arith.constant 0 : index
    %11 = vector.load %arg6[%c0_7, %c0_8] : memref<6x32xbf16, #tpu.memory_space<vmem>>, vector<6x32xbf16>
    %cst_9 = arith.constant dense<0.000000e+00> : vector<6x512xf32>
    %12 = tpu.matmul %11, %10, %cst_9 {dimension_numbers = #tpu.dot_dimension_numbers<[1], [0], [0], [1], [0, 0, 1, 1], [], []>} : vector<6x32xbf16>, vector<32x512xbf16>, vector<6x512xf32> -> vector<6x512xf32>
    %c0_10 = arith.constant 0 : index
    %c0_11 = arith.constant 0 : index
    %13 = vector.load %arg7[%c0_10, %c0_11] : memref<6x1xf32, #tpu.memory_space<vmem>>, vector<6x1xf32>
    %14 = vector.broadcast %13 : vector<6x1xf32> to vector<6x512xf32>
    %15 = arith.addf %12, %14 : vector<6x512xf32>
    %16 = tpu.iota {dimensions = array<i32: 1>} : vector<1x512xi32>
    %c512_i32 = arith.constant 512 : i32
    %17 = arith.muli %arg0, %c512_i32 : i32
    %18 = vector.broadcast %17 : i32 to vector<1x512xi32>
    %19 = arith.addi %16, %18 : vector<1x512xi32>
    %c256_i32 = arith.constant 256 : i32
    %20 = vector.broadcast %c256_i32 : i32 to vector<1x512xi32>
    %21 = arith.cmpi sge, %19, %20 : vector<1x512xi32>
    %c768_i32 = arith.constant 768 : i32
    %22 = vector.broadcast %c768_i32 : i32 to vector<1x512xi32>
    %23 = arith.cmpi slt, %19, %22 : vector<1x512xi32>
    %24 = arith.andi %21, %23 : vector<1x512xi1>
    %25 = vector.extract_strided_slice %15 {offsets = [0, 0], sizes = [2, 512], strides = [1, 1]} : vector<6x512xf32> to vector<2x512xf32>
    %26 = vector.extract_strided_slice %15 {offsets = [2, 0], sizes = [2, 512], strides = [1, 1]} : vector<6x512xf32> to vector<2x512xf32>
    %cst_12 = arith.constant 0.000000e+00 : f32
    %27 = vector.shape_cast %24 : vector<1x512xi1> to vector<1x512xi1>
    %28 = vector.broadcast %27 : vector<1x512xi1> to vector<2x512xi1>
    %29 = vector.broadcast %cst_12 : f32 to vector<2x512xf32>
    %30 = arith.select %28, %26, %29 : vector<2x512xi1>, vector<2x512xf32>
    %31 = vector.extract_strided_slice %15 {offsets = [4, 0], sizes = [2, 512], strides = [1, 1]} : vector<6x512xf32> to vector<2x512xf32>
    %c0_13 = arith.constant 0 : index
    %c0_14 = arith.constant 0 : index
    %32 = vector.load %arg3[%c0_13, %c0_14] : memref<1x512xbf16, #tpu.memory_space<vmem>>, vector<1x512xbf16>
    %33 = arith.extf %32 : vector<1x512xbf16> to vector<1x512xf32>
    %34 = vector.broadcast %33 : vector<1x512xf32> to vector<2x512xf32>
    %35 = arith.mulf %31, %34 : vector<2x512xf32>
    %36 = arith.addf %25, %30 : vector<2x512xf32>
    %37 = arith.addf %36, %35 : vector<2x512xf32>
    %cst_15 = arith.constant 0.000000e+00 : f32
    %38 = vector.broadcast %cst_15 : f32 to vector<2x512xf32>
    %39 = arith.maximumf %37, %38 : vector<2x512xf32>
    %c0_16 = arith.constant 0 : index
    %c0_17 = arith.constant 0 : index
    %c0_18 = arith.constant 0 : index
    %40 = vector.load %arg8[%c0_16, %c0_17, %c0_18] : memref<1x2x512xf32, #tpu.memory_space<vmem>>, vector<1x2x512xf32>
    %41 = vector.shape_cast %40 : vector<1x2x512xf32> to vector<2x512xf32>
    %42 = vector.shape_cast %39 : vector<2x512xf32> to vector<1x2x512xf32>
    tpu.vector_store %arg8[%c0_16, %c0_17, %c0_18], %42 {strides = array<i32>} : memref<1x2x512xf32, #tpu.memory_space<vmem>>, vector<1x2x512xf32>,
    return
  }
  func.func @transform_0(%arg0: i32, %arg1: i32) -> (i32, i32, i32) {
    %c0_i32 = arith.constant 0 : i32
    %c0_i32_0 = arith.constant 0 : i32
    return %arg1, %c0_i32, %arg0 : i32, i32, i32
  }
  func.func @transform_1(%arg0: i32, %arg1: i32) -> (i32, i32) {
    %c0_i32 = arith.constant 0 : i32
    %c0_i32_0 = arith.constant 0 : i32
    return %c0_i32, %arg0 : i32, i32
  }
  func.func @transform_2(%arg0: i32, %arg1: i32) -> (i32, i32) {
    %c0_i32 = arith.constant 0 : i32
    %c0_i32_0 = arith.constant 0 : i32
    %c0_i32_1 = arith.constant 0 : i32
    return %c0_i32, %c0_i32_0 : i32, i32
  }
  func.func @transform_3(%arg0: i32, %arg1: i32) -> (i32, i32) {
    %c0_i32 = arith.constant 0 : i32
    %c0_i32_0 = arith.constant 0 : i32
    %c0_i32_1 = arith.constant 0 : i32
    return %c0_i32, %c0_i32_0 : i32, i32
  }
  func.func @transform_4(%arg0: i32, %arg1: i32) -> (i32, i32) {
    %c0_i32 = arith.constant 0 : i32
    %c0_i32_0 = arith.constant 0 : i32
    %c0_i32_1 = arith.constant 0 : i32
    return %c0_i32, %c0_i32_0 : i32, i32
  }
  func.func @transform_5(%arg0: i32, %arg1: i32) -> (i32, i32) {
    %c0_i32 = arith.constant 0 : i32
    %c0_i32_0 = arith.constant 0 : i32
    %c0_i32_1 = arith.constant 0 : i32
    return %c0_i32, %c0_i32_0 : i32, i32
  }
  func.func @transform_6(%arg0: i32, %arg1: i32) -> (i32, i32, i32) {
    %c0_i32 = arith.constant 0 : i32
    %c0_i32_0 = arith.constant 0 : i32
    return %arg1, %c0_i32, %arg0 : i32, i32, i32
  }
}

</mosaic_0001>

<bundles_post_ra>
// kernel: a_call__.1
= control target key start
LH: loop header
LB: loop body
LE: loop exit
PB: predicated region body
PF: predicated region fallthrough
CT: control target
= control target key end

     0   :  { %s1037_s21 = smov 0   ;;  %s1039_s22 = smov 0   ;;  %s1178_s0 = inlined_call_operand.vmem [shape: f32[2,3,1024], index: 0, kind: input, shape index: {}]   ;;  %s1179_s1 = inlined_call_operand.vmem [shape: bf16[1,1024], index: 1, kind: input, shape index: {}]   ;;  %s1180_s2 = inlined_call_operand.vmem [shape: bf16[32,3], index: 2, kind: input, shape index: {}]   ;;  %s1181_s3 = inlined_call_operand.vmem [shape: bf16[32,1], index: 3, kind: input, shape index: {}]   ;;  %s1182_s4 = inlined_call_operand.vmem [shape: bf16[6,32], index: 4, kind: input, shape index: {}]   ;;  %s1183_s5 = inlined_call_operand.vmem [shape: f32[6,1], index: 5, kind: input, shape index: {}]   ;;  %s1184_s6 = inlined_call_operand.vmem [shape: f32[2,2,1024], index: 6, kind: output, shape index: {}]  }
   0x1   :  { %s1041_s23 = smov 0   ;;  %s1043_s24 = smov 0  }
   0x2   :  { %s1045_s25 = smov 0  }
   0x3 LB: > { %s25_s26 = sadd.s32 1, %s988_s23  ;;  %s28_s27 = sadd.s32 1, %s992_s24  ;;  %s996_s25 = sphi %s1045_s25, %s16_s25   ;;  %s992_s24 = sphi %s1043_s24, %s1196_s24   ;;  %s988_s23 = sphi %s1041_s23, %s1195_s23   ;;  %s984_s22 = sphi %s1039_s22, %s1194_s22   ;;  %s980_s21 = sphi %s1037_s21, %s1193_s21  }
   0x4   : > { %p26_p0 = scmp.ge.s32.totalorder %s25_s26, 2  ;;  %p887_p1 = scmp.ge.s32.totalorder %s996_s25, 1 }
   0x5   : > { %p243_p2 = scmp.lt.s32.totalorder %s996_s25, 5 }
   0x6   : > { %s1198_s26 = smov (%p26_p0, %s25_s26), 0  ;;  %s1200_s27 = smov (!%p26_p0, %s28_s27), %s992_s24 }
   0x7   : > { %p244_p3 = pnand %p887_p1, %p243_p2  ;;  %p30_p4 = scmp.ge.s32.totalorder %s1200_s27, 2 }
   0x8   : > { %s888_s28 = sshll.u32 (!%p244_p3), %s984_s22, 2  ;;  %p286_p5 = scmp.lt.s32.totalorder (!%p244_p3), %s980_s21, 1 }
   0x9   : > { %s1202_s27 = smov (%p30_p4, %s1200_s27), 0  ;;  %247 = sbr.rel (%p244_p3) target bundleno = 466 (0x1d2), region = 44 }
   0xa   : > { %p288_p6 = scmp.lt.s32.totalorder (!%p244_p3), %s888_s28, 7  ;;  %s905_s14 = sshll.u32 (!%p244_p3), %s984_s22, 9 }
   0xe   : > { %v998_v0 = vmov 0   ;;  %s1204_s21 = smov (!%p286_p5, %s980_s21), 1  ;;  %vm344_vm0 = vcmask 1040384   ;;  %s1206_s28 = smov (!%p288_p6, %s888_s28), 7  ;;  %v474_v1 = vld [vmem:[%s1181_s3] sm:$0xf]  ;;  %v486_v25 = vlaneseq }
   0xf   : > { %392 = vmatprep.mubr.bf16.mxu0 %v998_v0  ;;  %445 = vmatprep.mubr.bf16.mxu1 %v998_v0  ;;  %s889_s7 = sshll.u32 %s1204_s21, 3  ;;  %v476_v2 = vld [vmem:[%s1181_s3 + $0x8] sm:$0xf]  ;;  %vm345_vm1 = vcmask 1041408   ;;  %v999_v3 = vmov 65535   ;;  %v956_v21 = vld [vmem:[%s1180_s2] sm:$0xff]  }
  0x10   : > { %953 = vset.pattern.permute.xlu1 %v998_v0  ;;  %952 = vset.pattern.permute.xlu0 %v998_v0  ;;  %s1083_s10 = sadd.s32 %s889_s7, %s1206_s28  ;;  %v346_v4 = vsel %vm344_vm0, 4294967295, %v999_v3  ;;  %v475_v5 = vld [vmem:[%s1181_s3 + $0x4] sm:$0xf]  ;;  %v477_v6 = vld [vmem:[%s1181_s3 + $0xc] sm:$0xf]  ;;  %vm337_vm2 = vcmask 23552  }
  0x11   : > { %480 = vperm.xlu1 %953, %v474_v1   ;;  %504 = vperm.xlu0 %952, %v476_v2   ;;  %s890_s13 = sshll.u32 %s1083_s10, 2  ;;  %v347_v8 = vsel %vm345_vm1, %v346_v4, 0  ;;  %v555_v14 = vld [vmem:[%s1183_s5] sm:$0x3f]  ;;  %v957_v22 = vld [vmem:[%s1180_s2 + $0x8] sm:$0xff]   ;;  %v1109_v32 = vshrl.u32 %v486_v25, 7 }
  0x12   : > { %s293_s18 = scalar_lea.vmem %s1178_s0, %s890_s13  ;;  %v1000_v23 = vmov 839922192   ;;  %vm561_vm3 = vcmask 261120   ;;  %s298_s13 = scalar_lea.vmem %s1179_s1, %s1206_s28 }
  0x13   : > { %v311_v7 = vld [vmem:[%s293_s18] sm:$0x77]  ;;  %v312_v9 = vld [vmem:[%s293_s18 + $0x8] sm:$0x77]  ;;  %v484_v24 = vunpack.c.l.s4 %v1000_v23  ;;  %s894_s22 = sshll.u32 %s1083_s10, 1 }
  0x14   : > { %v315_v10 = vcombine.high %v311_v7, %v311_v7  ;;  %v316_v11 = vcombine.high %v312_v9, %v312_v9  ;;  %v319_v12 = vpack.c.bf16 %v311_v7, %v311_v7  ;;  %v321_v13 = vpack.c.bf16 %v312_v9, %v312_v9  ;;  %s308_s16 = scalar_lea.vmem %s1184_s6, %s894_s22 }
  0x15   : > { %492 = vperm.xlu1 %953, %v475_v5   ;;  %516 = vperm.xlu0 %952, %v477_v6   ;;  %v485_v31 = vunpack.c.0.s8 %v484_v24 }
  0x16   : > { %v320_v15 = vpack.c.bf16 %v315_v10, %v315_v10  ;;  %v322_v16 = vpack.c.bf16 %v316_v11, %v316_v11  ;;  %v349_v17 = vand.u32 %v347_v8, %v319_v12  ;;  %v355_v18 = vand.u32 %v347_v8, %v321_v13 }
  0x17   : > { %v488_v38 = vsub.s32 %v485_v31, %v1109_v32 }
  0x18   : > { %v352_v19 = vand.u32 %v347_v8, %v320_v15  ;;  %v358_v20 = vand.u32 %v347_v8, %v322_v16  ;;  %v554_v16 = vld [vmem:[%s1182_s4] sm:$0x7] }
  0x19   : > { %558 = vperm.xlu0 %952, %v555_v14  }
  0x1a   : > { %374 = vmatprep.subr.bf16.mxu0 %v352_v19  ;;  %427 = vmatprep.subr.bf16.mxu1 %v358_v20  ;;  %v653_v19 = vstv %s905_s14 }
  0x1b   : > { %375 = vmatpush1.bf16.msra.mxu0 %v349_v17  ;;  %428 = vmatpush1.bf16.msra.mxu1 %v355_v18  ;;  %v648_v17 = vand.u32 127, %v486_v25  ;;  %v682_v18 = vld [vmem:[%s298_s13] sm:$0xf] }
  0x1d   : > { %v650_v20 = vadd.s32 256, %v648_v17  ;;  %v654_v23 = vadd.s32 %v653_v19, %v648_v17  ;;  %v649_v24 = vadd.s32 128, %v648_v17 }
  0x1e   : > { %897 = vmatmul.mubr.msk.bf16.vlgmr.msra.gmra.mxu0 %vm337_vm2, %v956_v21  ;;  %899 = vmatmul.mubr.msk.bf16.vlgmr.msra.gmra.mxu1 %vm337_vm2, %v956_v21  ;;  %v687_v21 = vsub.s32 0, %v1109_v32 }
  0x1f   : > { %402 = vmatprep.mubr.bf16.mxu0 %v998_v0  ;;  %455 = vmatprep.mubr.bf16.mxu1 %v998_v0  ;;  %vm658_vm4 = vcmp.ge.s32.totalorder %v654_v23, 256  ;;  %vm662_vm5 = vcmp.lt.s32.totalorder %v654_v23, 768  ;;  %v655_v25 = vadd.s32 %v653_v19, %v649_v24 }
  0x20   : > { %vm1133_vm8 = vmand %vm658_vm4, %vm662_vm5 }
  0x21   : > { %vm659_vm10 = vcmp.ge.s32.totalorder %v655_v25, 256  ;;  %vm663_vm11 = vcmp.lt.s32.totalorder %v655_v25, 768 }
  0x22   : > { %vm1145_vm14 = vmand %vm659_vm10, %vm663_vm11 }
  0x26   : > { %898 = vmatmul.mubr.msk.bf16.gmra.mxu0 %vm337_vm2, %v957_v22  ;;  %900 = vmatmul.mubr.msk.bf16.gmra.mxu1 %vm337_vm2, %v957_v22  ;;  %v695_v22 = vsub.s32 4, %v1109_v32 }
  0x27   : > { %597 = vmatprep.mubr.bf16.mxu0 %v998_v0  ;;  %638 = vmatprep.mubr.bf16.mxu1 %v998_v0 }
  0x8c   : > { %v481_v28 = vpop.permute.xlu1 %480  ;;  %v505_v33 = vpop.permute.xlu0 %504 }
  0x8d   : > { %v513_v43 = vrot.slane %v505_v33, %v488_v38  ;;  %v489_v47 = vrot.slane %v481_v28, %v488_v38  ;;  %v691_v28 = vsub.s32 2, %v1109_v32 }
  0x90   : > { %v493_v39 = vpop.permute.xlu1 %492  ;;  %v517_v42 = vpop.permute.xlu0 %516 }
  0x91   : > { %v525_v44 = vrot.slane %v517_v42, %v488_v38  ;;  %v501_v48 = vrot.slane %v493_v39, %v488_v38 }
  0x93   : > { %v902_v55 = vcombine.low %v513_v43, %v525_v44  ;;  %v901_v58 = vcombine.low %v489_v47, %v501_v48 }
  0xde   : > { %v394_v26 = vpop.f32.mrf.mxu0  ;;  %v447_v27 = vpop.f32.mrf.mxu1 }
  0xe0   : > { %v396_v29 = vpop.f32.mrf.mxu0  ;;  %v449_v30 = vpop.f32.mrf.mxu1 }
  0xe2   : > { %v398_v34 = vpop.f32.mrf.mxu0  ;;  %v451_v35 = vpop.f32.mrf.mxu1 }
  0xe3   : > { %v466_v61 = vpack.c.bf16 %v398_v34, %v394_v26  ;;  %v468_v62 = vpack.c.bf16 %v451_v35, %v447_v27  ;;  %v656_v26 = vadd.s32 %v653_v19, %v650_v20  ;;  %v651_v27 = vadd.s32 384, %v648_v17 }
  0xe4   : > { %v400_v36 = vpop.f32.mrf.mxu0  ;;  %v453_v37 = vpop.f32.mrf.mxu1 }
  0xe5   : > { %v467_v51 = vpack.c.bf16 %v400_v36, %v396_v29  ;;  %v469_v52 = vpack.c.bf16 %v453_v37, %v449_v30  ;;  %v538_v8 = vadd.bf16 %v901_v58, %v466_v61  ;;  %v540_v9 = vadd.bf16 %v901_v58, %v468_v62  ;;  %v559_v36 = vpop.permute.xlu0 %558 }
  0xe6   : > { %v404_v40 = vpop.f32.mrf.mxu0  ;;  %v457_v41 = vpop.f32.mrf.mxu1  ;;  %v699_v29 = vsub.s32 6, %v1109_v32  ;;  %vm660_vm6 = vcmp.ge.s32.totalorder %v656_v26, 256  ;;  %vm664_vm7 = vcmp.lt.s32.totalorder %v656_v26, 768  ;;  %v657_v33 = vadd.s32 %v653_v19, %v651_v27 }
  0xe7   : > { %v539_v2 = vadd.bf16 %v901_v58, %v467_v51  ;;  %v541_v3 = vadd.bf16 %v901_v58, %v469_v52  ;;  %v546_v14 = vmax.bf16 %v998_v0, %v538_v8  ;;  %v548_v15 = vmax.bf16 %v998_v0, %v540_v9  ;;  %vm1137_vm9 = vmand %vm660_vm6, %vm664_vm7 }
  0xe8   : > { %v406_v45 = vpop.f32.mrf.mxu0  ;;  %v459_v46 = vpop.f32.mrf.mxu1  ;;  %vm661_vm12 = vcmp.ge.s32.totalorder %v657_v33, 256  ;;  %vm665_vm13 = vcmp.lt.s32.totalorder %v657_v33, 768 }
  0xe9   : > { %v547_v12 = vmax.bf16 %v998_v0, %v539_v2  ;;  %v549_v13 = vmax.bf16 %v998_v0, %v541_v3  ;;  %vm1150_vm15 = vmand %vm661_vm12, %vm665_vm13 }
  0xea   : > { %v408_v49 = vpop.f32.mrf.mxu0  ;;  %v461_v50 = vpop.f32.mrf.mxu1 }
  0xeb   : > { %v470_v53 = vpack.c.bf16 %v408_v49, %v404_v40  ;;  %v472_v54 = vpack.c.bf16 %v461_v50, %v457_v41 }
  0xec   : > { %v410_v56 = vpop.f32.mrf.mxu0  ;;  %v463_v57 = vpop.f32.mrf.mxu1 }
  0xed   : > { %v471_v59 = vpack.c.bf16 %v410_v56, %v406_v45  ;;  %v473_v60 = vpack.c.bf16 %v463_v57, %v459_v46  ;;  %v542_v63 = vadd.bf16 %v902_v55, %v470_v53  ;;  %v544_v1 = vadd.bf16 %v902_v55, %v472_v54 }
  0xef   : > { %v543_v4 = vadd.bf16 %v902_v55, %v471_v59  ;;  %v545_v5 = vadd.bf16 %v902_v55, %v473_v60  ;;  %v550_v10 = vmax.bf16 %v998_v0, %v542_v63  ;;  %v552_v11 = vmax.bf16 %v998_v0, %v544_v1 }
  0xf0   : > { %v1001_v63 = vmov 1983009808  }
  0xf1   : > { %v551_v6 = vmax.bf16 %v998_v0, %v543_v4  ;;  %v553_v7 = vmax.bf16 %v998_v0, %v545_v5  ;;  %v683_v0 = vunpack.c.l.bf16 %v682_v18  ;;  %v768_v1 = vunpack.c.l.s4 %v1001_v63 }
  0xf3   : > { %577 = vmatprep.subr.bf16.mxu0 %v551_v6  ;;  %618 = vmatprep.subr.bf16.mxu1 %v553_v7  ;;  %v688_v30 = vrot.slane %v683_v0, %v687_v21  ;;  %v696_v31 = vrot.slane %v683_v0, %v695_v22  ;;  %v692_v34 = vrot.slane %v683_v0, %v691_v28 }
  0xf4   : > { %578 = vmatpush1.bf16.msra.mxu0 %v550_v10  ;;  %619 = vmatpush1.bf16.msra.mxu1 %v552_v11  ;;  %v700_v35 = vrot.slane %v683_v0, %v699_v29 }
  0xf5   : > { %579 = vmatprep.subr.bf16.mxu0 %v547_v12  ;;  %620 = vmatprep.subr.bf16.mxu1 %v549_v13  ;;  %v708_v38 = vrot.slane %v688_v30, %v687_v21  ;;  %v716_v39 = vrot.slane %v696_v31, %v687_v21  ;;  %v712_v46 = vrot.slane %v692_v34, %v687_v21 }
  0xf6   : > { %v720_v48 = vrot.slane %v700_v35, %v687_v21 }
  0xf8   : > { %580 = vmatpush1.bf16.msra.mxu0 %v546_v14  ;;  %621 = vmatpush1.bf16.msra.mxu1 %v548_v15  ;;  %v769_v15 = vunpack.c.0.s8 %v768_v1 }
  0xfa   : > { %v772_v22 = vsub.s32 %v769_v15, %v1109_v32 }
  0xfb   : > { %903 = vmatmul.mubr.msk.bf16.vlgmr.msra.gmra.mxu0 %vm561_vm3, %v554_v16  ;;  %904 = vmatmul.mubr.msk.bf16.vlgmr.msra.gmra.mxu1 %vm561_vm3, %v554_v16 }
 0x1bb   : > { %v599_v40 = vpop.f32.mrf.mxu0  ;;  %v640_v41 = vpop.f32.mrf.mxu1 }
 0x1bc   : > { %v600_v43 = vadd.f32 %v599_v40, %v559_v36  ;;  %v641_v44 = vadd.f32 %v640_v41, %v559_v36 }
 0x1bd   : > { %v601_v45 = vpop.f32.mrf.mxu0  ;;  %v642_v47 = vpop.f32.mrf.mxu1 }
 0x1be   : > { %v678_v49 = vsel %vm1133_vm8, %v600_v43, 0.0  ;;  %v721_v50 = vmul.f32 %v708_v38, %v600_v43  ;;  %v680_v51 = vsel %vm1137_vm9, %v641_v44, 0.0  ;;  %v723_v52 = vmul.f32 %v716_v39, %v641_v44 }
 0x1bf   : > { %v729_v54 = vrot.slane %v678_v49, 2  ;;  %v731_v55 = vrot.slane %v680_v51, 2  ;;  %v602_v56 = vadd.f32 %v601_v45, %v559_v36  ;;  %v643_v57 = vadd.f32 %v642_v47, %v559_v36  ;;  %v603_v59 = vpop.f32.mrf.mxu0  ;;  %v644_v60 = vpop.f32.mrf.mxu1 }
 0x1c0   : > { %v745_v61 = vrot.slane %v721_v50, 4  ;;  %v747_v62 = vrot.slane %v723_v52, 4 }
 0x1c1   : > { %v737_v2 = vadd.f32 %v729_v54, %v600_v43  ;;  %v739_v3 = vadd.f32 %v731_v55, %v641_v44  ;;  %v679_v4 = vsel %vm1145_vm14, %v602_v56, 0.0  ;;  %v722_v5 = vmul.f32 %v712_v46, %v602_v56  ;;  %v604_v6 = vpop.f32.mrf.mxu0  ;;  %v645_v7 = vpop.f32.mrf.mxu1 }
 0x1c2   : > { %v730_v8 = vrot.slane %v679_v4, 2  ;;  %v681_v9 = vsel %vm1150_vm15, %v643_v57, 0.0  ;;  %v724_v10 = vmul.f32 %v720_v48, %v643_v57 }
 0x1c3   : > { %v746_v11 = vrot.slane %v722_v5, 4  ;;  %v732_v12 = vrot.slane %v681_v9, 2  ;;  %v753_v13 = vadd.f32 %v745_v61, %v737_v2  ;;  %v755_v17 = vadd.f32 %v747_v62, %v739_v3 }
 0x1c4   : > { %v738_v14 = vadd.f32 %v730_v8, %v602_v56  ;;  %v748_v16 = vrot.slane %v724_v10, 4 }
 0x1c5   : > { %v740_v18 = vadd.f32 %v732_v12, %v643_v57  ;;  %v757_v0 = vmax.f32 %v753_v13, 0.0  ;;  %v759_v23 = vmax.f32 %v755_v17, 0.0 }
 0x1c6   : > { %v754_v19 = vadd.f32 %v746_v11, %v738_v14 }
 0x1c7   : > { %v756_v20 = vadd.f32 %v748_v16, %v740_v18 }
 0x1c8   : > { %v758_v21 = vmax.f32 %v754_v19, 0.0 }
 0x1c9   : > { %v760_v24 = vmax.f32 %v756_v20, 0.0 }
 0x1ca   : > { %v765_v26 = vcombine.low %v757_v0, %v758_v21 }
 0x1cb   : > { %v766_v27 = vcombine.low %v759_v23, %v760_v24 }
 0x1cc   : > { %v773_v28 = vrot.slane %v765_v26, %v772_v22 }
 0x1cd   : > { %v780_v29 = vrot.slane %v766_v27, %v772_v22 }
 0x1cf   : > { %v781_v30 = vcombine.low %v773_v28, %v780_v29 }
 0x1d1   : > { %783 = vst [vmem:[%s308_s16] sm:$0xff] %v781_v30 }
 0x1d2 PF: > { %s16_s25 = sadd.s32 1, %s996_s25   ;;  %s1193_s21 = smov %s988_s23 }
 0x1d3   : > { %p13_p7 = scmp.ge.s32.totalorder %s16_s25, 6   ;;  %s1194_s22 = smov %s992_s24 }
 0x1d4   : > { %s1195_s23 = smov %s1198_s26  ;;  %s1196_s24 = smov %s1202_s27 }
 0x1d5   :  { %15 = sbr.rel (!%p13_p7) target bundleno = 3 (0x3), region = 77 }

</bundles_post_ra>
